<compile_context>
chip_gen: v6e
topology: v6e:2x2x1
jax: 0.10.0
libtpu: 0.0.40
codegen_flags: <defaults>
</compile_context>

<pallas_src>
import functools

import numpy as np
import jax
import jax.numpy as jnp
from jax.experimental import pallas as pl
from jax.experimental.pallas import tpu as pltpu

BN_EPS = 1e-5
LANE = 128
VMEM_LIMIT = 32 * 1024 * 1024  # explicit scoped-VMEM limit (safe on v5e/v6e/v7x)


def _round_up(v, m):
    return ((v + m - 1) // m) * m


def _pad2d(m, rows, cols):
    r, c = m.shape
    if r == rows and c == cols:
        return m
    return jnp.pad(m, ((0, rows - r), (0, cols - c)))


def _pick_tile(n, requested):
    """Adaptive tile: lane-aligned, no larger than the padded node count, and
    (when possible) small enough that the row grid has >= 2 tiles so v7x's
    two TensorCores both get work. No-op for v5e/v6e (single TC)."""
    n128 = _round_up(max(n, 1), LANE)
    tile = min(_round_up(requested, LANE), n128)
    if n128 // tile < 2 and n128 >= 2 * LANE:
        tile = max(LANE, ((n128 // 2) // LANE) * LANE)
    return tile


# ---------------------------------------------------------------------------
# Kernels
# ---------------------------------------------------------------------------
def transform_kernel(x_ref, w_ref, o_ref):
    """o = x @ w   (bf16 inputs, f32 MXU accumulation)."""
    o_ref[...] = jnp.dot(x_ref[...], w_ref[...],
                         preferred_element_type=jnp.float32).astype(o_ref.dtype)


def aggregate_kernel(a_ref, xw_ref, b_ref, *rest, fuse_relu_w2):
    """acc += A_tile @ XW_tile over the contraction grid axis; on the last
    step add the bias and (optionally) apply ReLU plus a fused epilogue
    matmul with the next layer's weight."""
    if fuse_relu_w2:
        w2_ref, o_ref, acc_ref = rest
    else:
        o_ref, acc_ref = rest

    k = pl.program_id(1)

    @pl.when(k == 0)
    def _():
        acc_ref[...] = jnp.zeros_like(acc_ref)

    acc_ref[...] += jnp.dot(a_ref[...], xw_ref[...],
                            preferred_element_type=jnp.float32)

    @pl.when(k == pl.num_programs(1) - 1)
    def _():
        h = acc_ref[...] + b_ref[...]
        if fuse_relu_w2:
            h = jnp.maximum(h, 0.0).astype(jnp.bfloat16)
            h = jnp.dot(h, w2_ref[...], preferred_element_type=jnp.float32)
        o_ref[...] = h.astype(o_ref.dtype)


# ---------------------------------------------------------------------------
# pallas_call wrappers
# ---------------------------------------------------------------------------
def _transform(x_p, w_p, *, tile_m):
    n_p, cin_p = x_p.shape
    cout_p = w_p.shape[1]
    cost = pl.CostEstimate(
        flops=int(2 * n_p * cin_p * cout_p),
        transcendentals=0,
        bytes_accessed=int(n_p * cin_p * 2 + cin_p * cout_p * 2 + n_p * cout_p * 2),
    )
    return pl.pallas_call(
        transform_kernel,
        out_shape=jax.ShapeDtypeStruct((n_p, cout_p), jnp.bfloat16),
        grid_spec=pltpu.PrefetchScalarGridSpec(
            num_scalar_prefetch=0,
            grid=(n_p // tile_m,),
            in_specs=[pl.BlockSpec((tile_m, cin_p), lambda i: (i, 0)),
                      pl.BlockSpec((cin_p, cout_p), lambda i: (0, 0))],
            out_specs=pl.BlockSpec((tile_m, cout_p), lambda i: (i, 0)),
        ),
        compiler_params=pltpu.CompilerParams(
            dimension_semantics=("parallel",),
            vmem_limit_bytes=VMEM_LIMIT),
        cost_estimate=cost,
    )(x_p, w_p)


def _aggregate(a_p, xw_p, b_p, *, w2_p, out_dtype, tile):
    n_p = a_p.shape[0]
    c_in = xw_p.shape[1]
    c_out = w2_p.shape[1] if w2_p is not None else c_in
    fuse = w2_p is not None
    out_bytes = jnp.dtype(out_dtype).itemsize

    in_specs = [
        pl.BlockSpec((tile, tile), lambda i, k: (i, k)),
        pl.BlockSpec((tile, c_in), lambda i, k: (k, 0)),
        pl.BlockSpec((1, c_in), lambda i, k: (0, 0)),
    ]
    args = [a_p, xw_p, b_p]
    if fuse:
        in_specs.append(pl.BlockSpec((c_in, c_out), lambda i, k: (0, 0)))
        args.append(w2_p)

    flops = 2 * n_p * n_p * c_in + (2 * n_p * c_in * c_out if fuse else 0)
    bytes_accessed = (n_p * n_p * 2                        # A_hat (bf16), streamed once
                      + (n_p // tile) * n_p * c_in * 2     # XW re-streamed per row tile
                      + n_p * c_out * out_bytes            # output
                      + (c_in * c_out * 2 if fuse else 0)  # fused W2
                      + c_in * 4)                          # bias
    cost = pl.CostEstimate(flops=int(flops), transcendentals=0,
                           bytes_accessed=int(bytes_accessed))

    return pl.pallas_call(
        functools.partial(aggregate_kernel, fuse_relu_w2=fuse),
        out_shape=jax.ShapeDtypeStruct((n_p, c_out), out_dtype),
        grid_spec=pltpu.PrefetchScalarGridSpec(
            num_scalar_prefetch=0,
            grid=(n_p // tile, n_p // tile),  # reduction axis last
            in_specs=in_specs,
            out_specs=pl.BlockSpec((tile, c_out), lambda i, k: (i, 0)),
            scratch_shapes=[pltpu.VMEM((tile, c_in), jnp.float32)],
        ),
        compiler_params=pltpu.CompilerParams(
            dimension_semantics=("parallel", "arbitrary"),
            vmem_limit_bytes=VMEM_LIMIT),
        cost_estimate=cost,
    )(*args)


def gcn_forward(x, a_hat, w1, b1, gamma, beta, run_mean, run_var, w2, b2,
                *, tile=512):
    """x: (batch, seq, in_channels) -> (batch, seq, out_channels)."""
    batch, seq, cin = x.shape
    n = batch * seq
    hidden = w1.shape[1]
    cout = w2.shape[1]

    # Fold eval-mode BatchNorm1d into layer-1 weight/bias:
    #   s = gamma / sqrt(var + eps);  W1' = W1 * s;  b1' = (b1 - mean) * s + beta
    s = (gamma * jax.lax.rsqrt(run_var + BN_EPS)).astype(jnp.float32)
    w1f = w1.astype(jnp.float32) * s[None, :]
    b1f = (b1.astype(jnp.float32) - run_mean.astype(jnp.float32)) * s \
        + beta.astype(jnp.float32)

    # Adaptive, lane-dense padding.  Same tile for the row and reduction axes
    # (guarantees full coverage of the padded A_hat); zero fill is exact.
    tile = _pick_tile(n, tile)
    cin_p = _round_up(cin, LANE)
    hid_p = _round_up(hidden, LANE)
    cout_p = _round_up(cout, LANE)
    n_p = _round_up(n, tile)
    assert n_p % tile == 0

    x_p = _pad2d(x.reshape(n, cin).astype(jnp.float32), n_p, cin_p)
    a_p = _pad2d(a_hat.astype(jnp.float32), n_p, n_p)
    w1_p = _pad2d(w1f, cin_p, hid_p)
    w2_p = _pad2d(w2.astype(jnp.float32), hid_p, cout_p)
    b1_p = _pad2d(b1f.reshape(1, hidden), 1, hid_p)
    b2_p = _pad2d(b2.reshape(1, cout).astype(jnp.float32), 1, cout_p)

    # bf16 matmul operands; accumulation stays f32 inside the kernels.
    x_p = x_p.astype(jnp.bfloat16)
    a_p = a_p.astype(jnp.bfloat16)
    w1_p = w1_p.astype(jnp.bfloat16)
    w2_p = w2_p.astype(jnp.bfloat16)

    # (1) XW1 = X @ W1'
    xw1 = _transform(x_p, w1_p, tile_m=tile)
    # (2) HW2 = relu(A_hat @ XW1 + b1') @ W2   (H stays in VMEM)
    hw2 = _aggregate(a_p, xw1, b1_p, w2_p=w2_p, out_dtype=jnp.bfloat16, tile=tile)
    # (3) O = A_hat @ HW2 + b2
    o = _aggregate(a_p, hw2, b2_p, w2_p=None, out_dtype=jnp.float32, tile=tile)

    return o[:n, :cout].reshape(batch, seq, cout)


# ---------------------------------------------------------------------------
# Host-side helpers / reference
# ---------------------------------------------------------------------------
def build_normalized_adj(adj_np):
    """Dense A_hat = D^-1/2 (A + I) D^-1/2 (GCNConv gcn_norm, add_self_loops)."""
    a = adj_np.astype(np.float32) + np.eye(adj_np.shape[0], dtype=np.float32)
    deg = a.sum(axis=1)
    d_inv_sqrt = 1.0 / np.sqrt(deg)
    return (d_inv_sqrt[:, None] * a * d_inv_sqrt[None, :]).astype(np.float32)


def reference_forward(x, a_hat, w1, b1, gamma, beta, run_mean, run_var, w2, b2):
    batch, seq, cin = x.shape
    n = batch * seq
    h = x.reshape(n, cin) @ w1
    h = a_hat @ h + b1[None, :]
    h = (h - run_mean[None, :]) * (gamma[None, :] / jnp.sqrt(run_var[None, :] + BN_EPS)) + beta[None, :]
    h = jnp.maximum(h, 0.0)
    o = a_hat @ (h @ w2) + b2[None, :]
    return o.reshape(batch, seq, -1)


if __name__ == "__main__":
    batch, seq = 2, 8
    in_channels, hidden_channels, out_channels = 4, 32, 4
    n_nodes = batch * seq  # adj is over the flattened batch*seq node set

    # Deterministic symmetric adjacency (ring + a few chords), zero diagonal.
    adj_np = np.zeros((n_nodes, n_nodes), dtype=np.float32)
    for i in range(n_nodes):
        adj_np[i, (i + 1) % n_nodes] = 1.0
        adj_np[(i + 1) % n_nodes, i] = 1.0
        adj_np[i, (i + 5) % n_nodes] = 1.0
        adj_np[(i + 5) % n_nodes, i] = 1.0
    a_hat = jnp.asarray(build_normalized_adj(adj_np))

    key = jax.random.PRNGKey(0)
    kx, k1, kb1, k2, kb2, kg, kb, km, kv = jax.random.split(key, 9)

    x = jax.random.normal(kx, (batch, seq, in_channels), dtype=jnp.float32)

    # GCNConv weights (stored already transposed: (in, out)) and biases.
    w1 = jax.random.normal(k1, (in_channels, hidden_channels), dtype=jnp.float32) * 0.1
    b1 = jax.random.normal(kb1, (hidden_channels,), dtype=jnp.float32) * 0.1
    w2 = jax.random.normal(k2, (hidden_channels, out_channels), dtype=jnp.float32) * 0.1
    b2 = jax.random.normal(kb2, (out_channels,), dtype=jnp.float32) * 0.1

    # BatchNorm1d(hidden) parameters + running stats (eval mode).
    gamma = 1.0 + 0.1 * jax.random.normal(kg, (hidden_channels,), dtype=jnp.float32)
    beta = 0.1 * jax.random.normal(kb, (hidden_channels,), dtype=jnp.float32)
    run_mean = 0.1 * jax.random.normal(km, (hidden_channels,), dtype=jnp.float32)
    run_var = jnp.abs(1.0 + 0.1 * jax.random.normal(kv, (hidden_channels,), dtype=jnp.float32))

    out = gcn_forward(x, a_hat, w1, b1, gamma, beta, run_mean, run_var, w2, b2)
    out = jax.block_until_ready(out)

    ref = reference_forward(x, a_hat, w1, b1, gamma, beta, run_mean, run_var, w2, b2)
    # bf16 matmul operands (f32 accumulation) -> relaxed tolerance vs f32 ref.
    np.testing.assert_allclose(np.asarray(out), np.asarray(ref), rtol=2e-2, atol=2e-2)
    assert out.shape == (batch, seq, out_channels)
    print("KERNEL_OK")
</pallas_src>

<mosaic_0001>
module attributes {stable_mosaic.version = 11 : i64} {
  func.func @transform_kernel(%arg0: i32, %arg1: memref<128x128xbf16, #tpu.memory_space<vmem>>, %arg2: memref<128x128xbf16, #tpu.memory_space<vmem>>, %arg3: memref<128x128xbf16, #tpu.memory_space<vmem>>) attributes {dimension_semantics = [#tpu.dimension_semantics<parallel>], iteration_bounds = array<i64: 1>, scalar_prefetch = 0 : i64, scratch_operands = 0 : i64, tpu.core_type = #tpu.core_type<tc>, window_params = [{transform_indices = @transform_0, window_bounds = array<i64: 128, 128>}, {pipeline_mode = #tpu.pipeline_mode<synchronous>, transform_indices = @transform_1, window_bounds = array<i64: 128, 128>}, {transform_indices = @transform_2, window_bounds = array<i64: 128, 128>}]} {
    %c0 = arith.constant 0 : index
    %c0_0 = arith.constant 0 : index
    %0 = vector.load %arg1[%c0, %c0_0] : memref<128x128xbf16, #tpu.memory_space<vmem>>, vector<128x128xbf16>
    %c0_1 = arith.constant 0 : index
    %c0_2 = arith.constant 0 : index
    %1 = vector.load %arg2[%c0_1, %c0_2] : memref<128x128xbf16, #tpu.memory_space<vmem>>, vector<128x128xbf16>
    %cst = arith.constant dense<0.000000e+00> : vector<128x128xf32>
    %2 = tpu.matmul %0, %1, %cst {dimension_numbers = #tpu.dot_dimension_numbers<[1], [0], [0], [1], [0, 0, 1, 1], [], []>} : vector<128x128xbf16>, vector<128x128xbf16>, vector<128x128xf32> -> vector<128x128xf32>
    %3 = arith.truncf %2 : vector<128x128xf32> to vector<128x128xbf16>
    %c0_3 = arith.constant 0 : index
    %c0_4 = arith.constant 0 : index
    %4 = vector.load %arg3[%c0_3, %c0_4] : memref<128x128xbf16, #tpu.memory_space<vmem>>, vector<128x128xbf16>
    tpu.vector_store %arg3[%c0_3, %c0_4], %3 {strides = array<i32>} : memref<128x128xbf16, #tpu.memory_space<vmem>>, vector<128x128xbf16>,
    return
  }
  func.func @transform_0(%arg0: i32) -> (i32, i32) {
    %c0_i32 = arith.constant 0 : i32
    %c0_i32_0 = arith.constant 0 : i32
    return %arg0, %c0_i32 : i32, i32
  }
  func.func @transform_1(%arg0: i32) -> (i32, i32) {
    %c0_i32 = arith.constant 0 : i32
    %c0_i32_0 = arith.constant 0 : i32
    %c0_i32_1 = arith.constant 0 : i32
    return %c0_i32, %c0_i32_0 : i32, i32
  }
  func.func @transform_2(%arg0: i32) -> (i32, i32) {
    %c0_i32 = arith.constant 0 : i32
    %c0_i32_0 = arith.constant 0 : i32
    return %arg0, %c0_i32 : i32, i32
  }
}

</mosaic_0001>

<bundles_post_ra>
// kernel: tpu_custom_call.1
= control target key start
LH: loop header
LB: loop body
LE: loop exit
PB: predicated region body
PF: predicated region fallthrough
CT: control target
= control target key end

     0   :  { %7 = vsyncpa [#allocation3], 0  ;;  %s648_s0 = inlined_call_operand.hbm [shape: bf16[128,128], index: 0, kind: input, shape index: {}]   ;;  %s649_s1 = inlined_call_operand.hbm [shape: bf16[128,128], index: 1, kind: input, shape index: {}]   ;;  %s650_s2 = inlined_call_operand.hbm [shape: bf16[128,128], index: 2, kind: output, shape index: {}]  }
   0x1   :  { %8 = vsyncpa [#allocation6], 0 }
   0x2   :  { %9 = vsyncpa [#allocation4], 0  ;;  %s610_s9 = smov [#allocation2]  }
   0x3   :  { %s15_s10 = sshll.u32 %s610_s9, 4  ;;  %s16_s10 = int_to_ptr.vmem [resolvable:$true] %s15_s10 }
   0x4   :  { %s552_s11 = scalar_lea.vmem %s16_s10, 1024  ;;  %p557_p1 = scmp.lt.s32.totalorder %s16_s10, %s16_s10 }
   0x5   :  { %p553_p0 = scmp.ne.s32.totalorder %s16_s10, %s552_s11  ;;  %p558_p2 = scmp.lt.s32.totalorder %s552_s11, %s552_s11 }
   0x7   :  { %p559_p3 = por %p558_p2, %p557_p1 }
   0x9   :  { %p560_p4 = pnand %p559_p3, %p553_p0 }
   0xb   :  { %563 = shalt.err (!%p560_p4)
}
   0xc   :  { %s611_s12 = smov 64   ;;  %s612_s13 = smov 4  }
   0xd   :  { %21 = dma.hbm_to_vmem [thread:$0]  %s648_s0, 1024, %s16_s10, [#allocation3], %s611_s12, %s611_s12, %s612_s13  }
   0xe   :  { %s613_s16 = smov [#allocation5]  }
   0xf   :  { %s27_s17 = sshll.u32 %s613_s16, 4  ;;  %s28_s17 = int_to_ptr.vmem [resolvable:$true] %s27_s17 }
  0x10   :  { %s572_s18 = scalar_lea.vmem %s28_s17, 1024  ;;  %p577_p6 = scmp.lt.s32.totalorder %s28_s17, %s28_s17 }
  0x11   :  { %p573_p5 = scmp.ne.s32.totalorder %s28_s17, %s572_s18  ;;  %p578_p7 = scmp.lt.s32.totalorder %s572_s18, %s572_s18 }
  0x13   :  { %p579_p8 = por %p578_p7, %p577_p6 }
  0x15   :  { %p580_p9 = pnand %p579_p8, %p573_p5 }
  0x17   :  { %583 = shalt.err (!%p580_p9)
}
  0x18   :  { %33 = dma.hbm_to_vmem [thread:$0]  %s649_s1, 1024, %s28_s17, [#allocation6], %s611_s12, %s611_s12, %s612_s13  }
  0x19   :  { %604 = dma.done.wait [#allocation3], 1024  }
  0x1a   :  { %605 = vsyncadd [#allocation3], 4294966272 }
  0x1b   :  { %606 = dma.done.wait [#allocation6], 1024  }
  0x1c   :  { %607 = vsyncadd [#allocation6], 4294966272  ;;  %v528_v0 = vld [vmem:[#allocation5 + $0x38] sm:$0xff]   ;;  %v529_v1 = vld [vmem:[#allocation5 + $0x30] sm:$0xff]   ;;  %s614_s0 = smov [#allocation7]  }
  0x1d   :  { %475 = vmatprep.subr.bf16.mxu0 %v528_v0  ;;  %507 = vmatprep.subr.bf16.mxu1 %v528_v0  ;;  %v530_v2 = vld [vmem:[#allocation5 + $0x28] sm:$0xff]   ;;  %v531_v3 = vld [vmem:[#allocation5 + $0x20] sm:$0xff]   ;;  %v532_v6 = vld [vmem:[#allocation5 + $0x18] sm:$0xff]   ;;  %s351_s1 = sshll.u32 %s614_s0, 4  ;;  %s352_s1 = int_to_ptr.vmem [resolvable:$true] %s351_s1 }
  0x1e   :  { %476 = vmatpush3.bf16.msra.mxu0 %v528_v0  ;;  %515 = vmatpush3.bf16.msra.mxu1 %v528_v0  ;;  %v536_v4 = vld [vmem:[#allocation2] sm:$0xff]   ;;  %v533_v7 = vld [vmem:[#allocation5 + $0x10] sm:$0xff]   ;;  %v534_v8 = vld [vmem:[#allocation5 + $0x8] sm:$0xff]   ;;  %s584_s21 = scalar_lea.vmem %s352_s1, 1024  ;;  %p589_p11 = scmp.lt.s32.totalorder %s352_s1, %s352_s1 }
  0x1f   :  { %477 = vmatprep.subr.bf16.mxu0 %v529_v1  ;;  %508 = vmatprep.subr.bf16.mxu1 %v529_v1  ;;  %v537_v5 = vld [vmem:[#allocation2 + $0x20] sm:$0xff]   ;;  %v538_v10 = vld [vmem:[#allocation2 + $0x8] sm:$0xff]   ;;  %v540_v12 = vld [vmem:[#allocation2 + $0x10] sm:$0xff]   ;;  %p585_p10 = scmp.ne.s32.totalorder %s352_s1, %s584_s21  ;;  %p590_p12 = scmp.lt.s32.totalorder %s584_s21, %s584_s21 }
  0x20   :  { %491 = vmatprep.mubr.bf16.mxu0 %v536_v4  ;;  %499 = vmatprep.mubr.bf16.mxu1 %v537_v5  ;;  %v535_v9 = vld [vmem:[#allocation5] sm:$0xff]   ;;  %v539_v11 = vld [vmem:[#allocation2 + $0x28] sm:$0xff]   ;;  %v541_v13 = vld [vmem:[#allocation2 + $0x30] sm:$0xff]  }
  0x21   :  { %v542_v14 = vld [vmem:[#allocation2 + $0x18] sm:$0xff]   ;;  %p591_p13 = por %p590_p12, %p589_p11 }
  0x22   :  { %478 = vmatpush3.bf16.msra.mxu0 %v529_v1  ;;  %516 = vmatpush3.bf16.msra.mxu1 %v529_v1  ;;  %v543_v15 = vld [vmem:[#allocation2 + $0x38] sm:$0xff]  }
  0x23   :  { %479 = vmatprep.subr.bf16.mxu0 %v530_v2  ;;  %509 = vmatprep.subr.bf16.mxu1 %v530_v2  ;;  %p592_p0 = pnand %p591_p13, %p585_p10 }
  0x26   :  { %480 = vmatpush3.bf16.msra.mxu0 %v530_v2  ;;  %517 = vmatpush3.bf16.msra.mxu1 %v530_v2 }
  0x27   :  { %481 = vmatprep.subr.bf16.mxu0 %v531_v3  ;;  %510 = vmatprep.subr.bf16.mxu1 %v531_v3 }
  0x2a   :  { %482 = vmatpush3.bf16.msra.mxu0 %v531_v3  ;;  %518 = vmatpush3.bf16.msra.mxu1 %v531_v3 }
  0x2b   :  { %483 = vmatprep.subr.bf16.mxu0 %v532_v6  ;;  %511 = vmatprep.subr.bf16.mxu1 %v532_v6 }
  0x2e   :  { %484 = vmatpush3.bf16.msra.mxu0 %v532_v6  ;;  %519 = vmatpush3.bf16.msra.mxu1 %v532_v6 }
  0x2f   :  { %485 = vmatprep.subr.bf16.mxu0 %v533_v7  ;;  %512 = vmatprep.subr.bf16.mxu1 %v533_v7 }
  0x32   :  { %486 = vmatpush3.bf16.msra.mxu0 %v533_v7  ;;  %520 = vmatpush3.bf16.msra.mxu1 %v533_v7 }
  0x33   :  { %487 = vmatprep.subr.bf16.mxu0 %v534_v8  ;;  %513 = vmatprep.subr.bf16.mxu1 %v534_v8 }
  0x36   :  { %488 = vmatpush3.bf16.msra.mxu0 %v534_v8  ;;  %521 = vmatpush3.bf16.msra.mxu1 %v534_v8 }
  0x37   :  { %489 = vmatprep.subr.bf16.mxu0 %v535_v9  ;;  %514 = vmatprep.subr.bf16.mxu1 %v535_v9 }
  0x3a   :  { %490 = vmatpush3.bf16.msra.mxu0 %v535_v9  ;;  %522 = vmatpush3.bf16.msra.mxu1 %v535_v9 }
  0x3d   :  { %492 = vmatmul.mubr.bf16.vlgmr.msra.gmra.mxu0 %v538_v10  ;;  %500 = vmatmul.mubr.bf16.vlgmr.msra.gmra.mxu1 %v539_v11 }
  0x3e   :  { %495 = vmatprep.mubr.bf16.mxu0 %v540_v12  ;;  %503 = vmatprep.mubr.bf16.mxu1 %v541_v13 }
  0x45   :  { %496 = vmatmul.mubr.bf16.gmra.mxu0 %v542_v14  ;;  %504 = vmatmul.mubr.bf16.gmra.mxu1 %v543_v15 }
  0xfd   :  { %v493_v16 = vpop.f32.mrf.mxu0  ;;  %v501_v17 = vpop.f32.mrf.mxu1 }
  0xff   :  { %v203_v18 = vpop.f32.mrf.mxu0  ;;  %v235_v19 = vpop.f32.mrf.mxu1 }
 0x101   :  { %v494_v20 = vpop.f32.mrf.mxu0  ;;  %v502_v21 = vpop.f32.mrf.mxu1 }
 0x102   :  { %v420_v22 = vpack.c.bf16 %v494_v20, %v493_v16  ;;  %v440_v23 = vpack.c.bf16 %v502_v21, %v501_v17 }
 0x103   :  { %v206_v24 = vpop.f32.mrf.mxu0  ;;  %v238_v25 = vpop.f32.mrf.mxu1 }
 0x104   :  { %452 = vst [vmem:[#allocation7 + $0x8] sm:$0xff] %v420_v22   ;;  %456 = vst [vmem:[#allocation7 + $0x28] sm:$0xff] %v440_v23   ;;  %v415_v26 = vpack.c.bf16 %v206_v24, %v203_v18  ;;  %v435_v27 = vpack.c.bf16 %v238_v25, %v235_v19 }
 0x105   :  { %v497_v28 = vpop.f32.mrf.mxu0  ;;  %v505_v29 = vpop.f32.mrf.mxu1 }
 0x106   :  { %416 = vst [vmem:[#allocation7] sm:$0xff] %v415_v26   ;;  %455 = vst [vmem:[#allocation7 + $0x20] sm:$0xff] %v435_v27  }
 0x107   :  { %v219_v30 = vpop.f32.mrf.mxu0  ;;  %v251_v31 = vpop.f32.mrf.mxu1 }
 0x109   :  { %v498_v32 = vpop.f32.mrf.mxu0  ;;  %v506_v33 = vpop.f32.mrf.mxu1 }
 0x10a   :  { %v430_v34 = vpack.c.bf16 %v498_v32, %v497_v28  ;;  %v450_v35 = vpack.c.bf16 %v506_v33, %v505_v29 }
 0x10b   :  { %v222_v36 = vpop.f32.mrf.mxu0  ;;  %v254_v37 = vpop.f32.mrf.mxu1 }
 0x10c   :  { %454 = vst [vmem:[#allocation7 + $0x18] sm:$0xff] %v430_v34   ;;  %458 = vst [vmem:[#allocation7 + $0x38] sm:$0xff] %v450_v35   ;;  %v425_v38 = vpack.c.bf16 %v222_v36, %v219_v30  ;;  %v445_v39 = vpack.c.bf16 %v254_v37, %v251_v31 }
 0x10e   :  { %453 = vst [vmem:[#allocation7 + $0x10] sm:$0xff] %v425_v38   ;;  %457 = vst [vmem:[#allocation7 + $0x30] sm:$0xff] %v445_v39  }
 0x10f   :  { %595 = shalt.err (!%p592_p0)
}
 0x110   :  { %357 = dma.vmem_to_hbm [thread:$0]  %s352_s1, 1024, %s650_s2, [#allocation4], %s611_s12, %s611_s12, %s612_s13  }
 0x111   :  { %608 = dma.done.wait [#allocation4], 1024  }
 0x112   :  { %609 = vsyncadd [#allocation4], 4294966272 }
 0x113   :  { %361 = vsyncpa [#allocation3], 1 }
 0x114   :  { %362 = vsyncpa [#allocation6], 1 }
 0x115   :  { %363 = vsyncpa [#allocation4], 1 }

</bundles_post_ra>
